<compile_context>
chip_gen: v7x
topology: tpu7x:2x2x1
jax: 0.10.0
libtpu: 0.0.40
codegen_flags: <defaults>
</compile_context>

<pallas_src>
import functools

import numpy as np
import jax
import jax.numpy as jnp
from jax import lax
from jax.experimental import pallas as pl
from jax.experimental.pallas import tpu as pltpu


def _round_up(x, m):
    return (x + m - 1) // m * m


# ----------------------------- Pallas kernel ------------------------------

def madf_fused_kernel(pm_ref, wm_ref, bm_ref, wf_ref, bf_ref, ep_ref,
                      m_ref, e_ref, sum_ref, ssq_ref, *, out_e, ke_pad):
    """One (batch, pixel-tile) grid step; pixels live on the lane axis.

    pm_ref  (Km, TP)              bf16  im2col patches of m_{l-1}
    wm_ref  (out_m, Km)           bf16  conv_m weight
    bm_ref  (out_m, 1)            f32   conv_m bias
    wf_ref  (out_e*Ke_pad, out_m) bf16  1x1 filter-generating conv weight (Ke zero-padded)
    bf_ref  (out_e*Ke_pad, 1)     f32   its bias (zero-padded)
    ep_ref  (Ke_pad, TP)          bf16  im2col patches of zero-padded e_{l-1} (Ke zero-padded)
    outputs: m (out_m, TP) bf16, e (out_e, TP) bf16, BN partial sum/ssq (out_e, 1) f32
    """
    # mask branch: m_l = ReLU(conv_m(m_{l-1}))  — im2col matmul, f32 MXU accumulation
    m = jnp.dot(wm_ref[...], pm_ref[...], preferred_element_type=jnp.float32)
    m = jnp.maximum(m + bm_ref[...], 0.0)                              # (out_m, TP) f32
    m_ref[...] = m.astype(m_ref.dtype)

    # per-pixel dynamic filters: 1x1 conv applied to m_l (row index = oe*Ke_pad + k)
    filt = jnp.dot(wf_ref[...], m.astype(wf_ref.dtype),
                   preferred_element_type=jnp.float32) + bf_ref[...]   # (out_e*Ke_pad, TP) f32

    # (out_e*Ke_pad, TP) -> (out_e, Ke_pad, TP) is a pure re-index (Ke_pad % 8 == 0,
    # no (8,128)-tile crossing); broadcast-multiply by the e-patches on the VPU
    # (f32: v5e-safe, no extra rounding) and contract over Ke_pad on the XLU.
    tp = filt.shape[-1]
    filt3 = filt.reshape(out_e, ke_pad, tp)
    ep = ep_ref[...].astype(jnp.float32)                               # (Ke_pad, TP) f32
    e = jnp.sum(filt3 * ep[None, :, :], axis=1)                        # (out_e, TP) f32
    e = jnp.maximum(e, 0.0)                                            # ReLU fused
    e_ref[...] = e.astype(e_ref.dtype)

    # per-tile BatchNorm partial statistics (f32, from the pre-quantization e).
    # Zero-padded pixel columns give ep == 0 -> e == 0 exactly; padded Ke rows have
    # zero weights/bias -> filt rows == 0; neither perturbs the statistics.
    sum_ref[...] = jnp.sum(e, axis=1, keepdims=True)
    ssq_ref[...] = jnp.sum(e * e, axis=1, keepdims=True)


# ------------------------------- glue (JAX) --------------------------------

def extract_patches(x, k, stride, pad, dtype):
    """x: (B, C, H, W) -> (B, C*k*k, out_h*out_w) im2col patches.

    The input is cast to `dtype` (bf16) *before* the k^2-fold inflation so the big
    patch tensor only ever moves through HBM at half width.
    Feature index = c*k*k + kh*k + kw (matches PyTorch conv-weight flattening).
    """
    xp = jnp.pad(x.astype(dtype), ((0, 0), (0, 0), (pad, pad), (pad, pad)))
    B, C, Hp, Wp = xp.shape
    out_h = (Hp - k) // stride + 1
    out_w = (Wp - k) // stride + 1
    cols = []
    for kh in range(k):
        for kw in range(k):
            cols.append(xp[:, :, kh:kh + stride * out_h:stride,
                           kw:kw + stride * out_w:stride])
    p = jnp.stack(cols, axis=2)                        # (B, C, k*k, oh, ow)
    p = p.reshape(B, C * k * k, out_h * out_w)
    return p, out_h, out_w


class MADFPallas:
    def __init__(self, in_channels_m, out_channels_m, in_channels_e, out_channels_e,
                 kernel_size_m, kernel_size_e, stride_m, stride_e, padding_m, padding_e,
                 key, tile_p=4096, compute_dtype=jnp.bfloat16):
        self.in_m, self.out_m = in_channels_m, out_channels_m
        self.in_e, self.out_e = in_channels_e, out_channels_e
        self.k_m, self.k_e = kernel_size_m, kernel_size_e
        self.s_m, self.s_e = stride_m, stride_e
        self.p_m, self.p_e = padding_m, padding_e
        self.tile_p = _round_up(tile_p, 128)
        self.compute_dtype = compute_dtype
        assert self.s_e == 1, "reference loop semantics assume stride_e == 1"

        Km = in_channels_m * kernel_size_m * kernel_size_m
        Ke = in_channels_e * kernel_size_e * kernel_size_e
        Ke_pad = _round_up(Ke, 8)          # sublane-aligned -> free in-kernel reshape
        cfilt = out_channels_e * Ke
        self.Km, self.Ke, self.Ke_pad, self.cfilt = Km, Ke, Ke_pad, cfilt

        k1, k2, k3, k4 = jax.random.split(key, 4)
        # deterministic synthetic parameters (shapes match the PyTorch conv_block layers)
        self.w_m = 0.1 * jax.random.normal(k1, (out_channels_m, in_channels_m,
                                                kernel_size_m, kernel_size_m), jnp.float32)
        self.b_m = 0.1 * jax.random.normal(k2, (out_channels_m,), jnp.float32)
        self.w_f = 0.1 * jax.random.normal(k3, (cfilt, out_channels_m, 1, 1), jnp.float32)
        self.b_f = 0.1 * jax.random.normal(k4, (cfilt,), jnp.float32)
        # BatchNorm2d(out_channels_e) at init: gamma=1, beta=0 (training-mode batch stats)
        self.gamma = jnp.ones((out_channels_e,), jnp.float32)
        self.beta = jnp.zeros((out_channels_e,), jnp.float32)
        self.eps = 1e-5

        cd = compute_dtype
        # weight slabs (bf16 HBM traffic; biases stay f32 and are added after the
        # f32 MXU accumulation).  Ke is zero-padded to Ke_pad on wf / bf.
        self.wm = self.w_m.reshape(out_channels_m, Km).astype(cd)                 # (out_m, Km)
        self.bm_col = self.b_m.reshape(out_channels_m, 1)                         # (out_m, 1)
        wf3 = jnp.pad(self.w_f.reshape(out_channels_e, Ke, out_channels_m),
                      ((0, 0), (0, Ke_pad - Ke), (0, 0)))
        self.wf = wf3.reshape(out_channels_e * Ke_pad, out_channels_m).astype(cd)  # (out_e*Ke_pad, out_m)
        self.bf_col = jnp.pad(self.b_f.reshape(out_channels_e, Ke),
                              ((0, 0), (0, Ke_pad - Ke))).reshape(-1, 1)           # (out_e*Ke_pad, 1)

        self._jit_forward = jax.jit(self._forward)

    def __call__(self, m_l_1, e_l_1):
        return self._jit_forward(m_l_1, e_l_1)

    # ---- static tile derivation: biggest lane-aligned TP that fits the VMEM budget
    def _derive_tile(self, Pb):
        TP = max(128, min(self.tile_p, _round_up(Pb, 128)))

        def vmem_est(tp):
            in_db = 2 * (self.Km + self.Ke_pad) * tp * 2            # double-buffered bf16 inputs
            out_db = 2 * (self.out_m + self.out_e) * tp * 2         # double-buffered bf16 outputs
            inter = (self.out_m + 2 * self.out_e * self.Ke_pad
                     + self.Ke_pad + self.out_e) * tp * 4           # f32 intermediates (m, filt, prod, ep, e)
            wts = 2 * ((self.out_m * self.Km
                        + self.out_e * self.Ke_pad * self.out_m) * 2
                       + (self.out_m + self.out_e * self.Ke_pad) * 4)
            return in_db + out_db + inter + wts

        budget = 24 * 1024 * 1024   # headroom under the 32 MiB scoped limit (v7x-safe: 64 MiB physical)
        while TP > 256 and vmem_est(TP) > budget:
            TP -= 128
        return TP

    def _forward(self, m_l_1, e_l_1):
        B = m_l_1.shape[0]
        cd = self.compute_dtype
        Km, Ke, Ke_pad = self.Km, self.Ke, self.Ke_pad
        out_m, out_e = self.out_m, self.out_e

        # batch-major im2col (bf16 before inflation); no channel-major transpose.
        pm, Nh, Nw = extract_patches(m_l_1, self.k_m, self.s_m, self.p_m, cd)   # (B, Km, Pb)
        pe, eh, ew = extract_patches(e_l_1, self.k_e, 1, self.p_e, cd)          # (B, Ke, Pb)
        assert (eh, ew) == (Nh, Nw), "e_l_1 window grid must match m_l spatial grid"
        Pb = Nh * Nw

        TP = self._derive_tile(Pb)
        num_tiles = pl.cdiv(Pb, TP)
        P_pad = num_tiles * TP
        # remainder tile: zero-pad the pixel axis (and Ke -> Ke_pad for pe); padded
        # pixels/rows yield e == 0 exactly and do not perturb the BN statistics.
        pm = jnp.pad(pm, ((0, 0), (0, 0), (0, P_pad - Pb)))
        pe = jnp.pad(pe, ((0, 0), (0, Ke_pad - Ke), (0, P_pad - Pb)))

        flops = (2 * B * P_pad * (out_m * Km + out_e * Ke_pad * out_m)
                 + B * P_pad * (3 * out_e * Ke_pad + 4 * out_e + 2 * out_m))
        bytes_accessed = ((pm.size + pe.size + self.wm.size + self.wf.size) * 2
                          + (self.bm_col.size + self.bf_col.size) * 4
                          + B * P_pad * (out_m + out_e) * 2
                          + 2 * B * num_tiles * out_e * 4)
        cost = pl.CostEstimate(flops=int(flops), transcendentals=0,
                               bytes_accessed=int(bytes_accessed))

        cparams = pltpu.CompilerParams(
            dimension_semantics=("parallel", "parallel"),   # B x tiles: megacore-shardable (v7x)
            vmem_limit_bytes=32 * 1024 * 1024)              # matches v7x default scoped limit

        kernel = functools.partial(madf_fused_kernel, out_e=out_e, ke_pad=Ke_pad)
        m_slab, e_slab, psum, pssq = pl.pallas_call(
            kernel,
            out_shape=(jax.ShapeDtypeStruct((B, out_m, P_pad), cd),
                       jax.ShapeDtypeStruct((B, out_e, P_pad), cd),
                       jax.ShapeDtypeStruct((B, num_tiles, out_e, 1), jnp.float32),
                       jax.ShapeDtypeStruct((B, num_tiles, out_e, 1), jnp.float32)),
            grid=(B, num_tiles),
            in_specs=[pl.BlockSpec((None, Km, TP), lambda b, i: (b, 0, i)),
                      pl.BlockSpec((out_m, Km), lambda b, i: (0, 0)),
                      pl.BlockSpec((out_m, 1), lambda b, i: (0, 0)),
                      pl.BlockSpec((out_e * Ke_pad, out_m), lambda b, i: (0, 0)),
                      pl.BlockSpec((out_e * Ke_pad, 1), lambda b, i: (0, 0)),
                      pl.BlockSpec((None, Ke_pad, TP), lambda b, i: (b, 0, i))],
            out_specs=(pl.BlockSpec((None, out_m, TP), lambda b, i: (b, 0, i)),
                       pl.BlockSpec((None, out_e, TP), lambda b, i: (b, 0, i)),
                       pl.BlockSpec((None, None, out_e, 1), lambda b, i: (b, i, 0, 0)),
                       pl.BlockSpec((None, None, out_e, 1), lambda b, i: (b, i, 0, 0))),
            compiler_params=cparams,
            cost_estimate=cost,
        )(pm, self.wm, self.bm_col, self.wf, self.bf_col, pe)

        # BatchNorm2d (training-mode batch statistics) from the f32 per-tile
        # partials; the affine apply stays in plain JAX so XLA fuses it with the
        # final reshape (no extra Pallas launch / HBM pass).
        count = B * Pb                       # padded pixels contribute exactly 0
        tot = jnp.sum(psum[..., 0], axis=(0, 1))
        tot_sq = jnp.sum(pssq[..., 0], axis=(0, 1))
        mean = tot / count
        # TODO(synk): E[x^2]-E[x]^2 in f32 (guarded); use two-pass/Welford if activations grow.
        var = jnp.maximum(tot_sq / count - mean * mean, 0.0)
        inv = lax.rsqrt(var + self.eps)
        scale = self.gamma * inv
        shift = self.beta - mean * self.gamma * inv

        m_l = m_slab[:, :, :Pb].astype(jnp.float32).reshape(B, out_m, Nh, Nw)
        e_l = (e_slab[:, :, :Pb].astype(jnp.float32) * scale[None, :, None]
               + shift[None, :, None]).reshape(B, out_e, Nh, Nw)
        return m_l, e_l


# ------------------------- pure-JAX reference check -------------------------

def madf_reference(mod, m_l_1, e_l_1):
    """Pure-JAX reference at HIGHEST precision, mirroring the kernel's deliberate
    bf16 quantization of patches / weights / stored slabs so the assertion isolates
    kernel-math correctness from the intentional low-precision HBM traffic."""
    hi = lax.Precision.HIGHEST
    q = lambda a: a.astype(mod.compute_dtype).astype(jnp.float32)
    B = m_l_1.shape[0]
    Km, Ke = mod.Km, mod.Ke

    pm, Nh, Nw = extract_patches(m_l_1, mod.k_m, mod.s_m, mod.p_m, mod.compute_dtype)
    pe, _, _ = extract_patches(e_l_1, mod.k_e, 1, mod.p_e, mod.compute_dtype)
    pm = pm.astype(jnp.float32)                      # (B, Km, P)
    pe = pe.astype(jnp.float32)                      # (B, Ke, P)
    P = Nh * Nw

    wm = q(mod.w_m.reshape(mod.out_m, Km))
    wf = q(mod.w_f.reshape(mod.out_e * Ke, mod.out_m))
    m = jax.nn.relu(jnp.einsum('ok,bkp->bop', wm, pm, precision=hi)
                    + mod.b_m[None, :, None])                               # (B, out_m, P) f32
    filt = (jnp.einsum('fo,bop->bfp', wf, q(m), precision=hi)
            + mod.b_f[None, :, None]).reshape(B, mod.out_e, Ke, P)
    e = jax.nn.relu(jnp.sum(filt * pe[:, None, :, :], axis=2))              # (B, out_e, P) f32

    mean = e.mean(axis=(0, 2))
    var = ((e - mean[None, :, None]) ** 2).mean(axis=(0, 2))
    inv = lax.rsqrt(var + mod.eps)
    e_q = q(e)                                      # kernel stores e in bf16 before BN
    e_bn = ((e_q - mean[None, :, None]) * inv[None, :, None]
            * mod.gamma[None, :, None] + mod.beta[None, :, None])

    m_l = q(m).reshape(B, mod.out_m, Nh, Nw)        # kernel stores m in bf16
    e_l = e_bn.reshape(B, mod.out_e, Nh, Nw)
    return m_l, e_l


if __name__ == "__main__":
    key = jax.random.PRNGKey(0)
    kp, km, ke = jax.random.split(key, 3)

    # small shapes; W=20 gives Pb = 16*20 = 320 pixels per batch, exercising the
    # remainder/zero-padding path (TP clamps to 384) and the per-(batch,tile)
    # BN-partial reduction across grid=(2, 1).
    B, Cm_in, Cm_out, Ce_in, Ce_out, H, W = 2, 4, 8, 4, 4, 16, 20
    madf = MADFPallas(in_channels_m=Cm_in, out_channels_m=Cm_out,
                      in_channels_e=Ce_in, out_channels_e=Ce_out,
                      kernel_size_m=3, kernel_size_e=3,
                      stride_m=1, stride_e=1, padding_m=1, padding_e=1,
                      key=kp, tile_p=4096, compute_dtype=jnp.bfloat16)

    m_l_1 = jax.random.normal(km, (B, Cm_in, H, W), jnp.float32)
    e_l_1 = jax.random.normal(ke, (B, Ce_in, H, W), jnp.float32)

    m_l, e_l = madf(m_l_1, e_l_1)
    jax.block_until_ready((m_l, e_l))

    m_ref, e_ref = madf_reference(madf, m_l_1, e_l_1)
    assert m_l.shape == (B, Cm_out, H, W) and e_l.shape == (B, Ce_out, H, W)
    np.testing.assert_allclose(np.asarray(m_l), np.asarray(m_ref), rtol=1e-2, atol=1e-2)
    np.testing.assert_allclose(np.asarray(e_l), np.asarray(e_ref), rtol=1e-2, atol=1e-2)

    print("KERNEL_OK")
</pallas_src>

<mosaic_0001>
module attributes {stable_mosaic.version = 11 : i64} {
  func.func @madf_fused_kernel(%arg0: i32, %arg1: i32, %arg2: memref<1x36x384xbf16, #tpu.memory_space<vmem>>, %arg3: memref<8x36xbf16, #tpu.memory_space<vmem>>, %arg4: memref<8x1xf32, #tpu.memory_space<vmem>>, %arg5: memref<160x8xbf16, #tpu.memory_space<vmem>>, %arg6: memref<160x1xf32, #tpu.memory_space<vmem>>, %arg7: memref<1x40x384xbf16, #tpu.memory_space<vmem>>, %arg8: memref<1x8x384xbf16, #tpu.memory_space<vmem>>, %arg9: memref<1x4x384xbf16, #tpu.memory_space<vmem>>, %arg10: memref<1x1x4x1xf32, #tpu.memory_space<vmem>>, %arg11: memref<1x1x4x1xf32, #tpu.memory_space<vmem>>) attributes {dimension_semantics = [#tpu.dimension_semantics<parallel>, #tpu.dimension_semantics<parallel>], iteration_bounds = array<i64: 2, 1>, scalar_prefetch = 0 : i64, scratch_operands = 0 : i64, tpu.core_type = #tpu.core_type<tc>, window_params = [{transform_indices = @transform_0, window_bounds = array<i64: 1, 36, 384>}, {pipeline_mode = #tpu.pipeline_mode<synchronous>, transform_indices = @transform_1, window_bounds = array<i64: 8, 36>}, {pipeline_mode = #tpu.pipeline_mode<synchronous>, transform_indices = @transform_2, window_bounds = array<i64: 8, 1>}, {pipeline_mode = #tpu.pipeline_mode<synchronous>, transform_indices = @transform_3, window_bounds = array<i64: 160, 8>}, {pipeline_mode = #tpu.pipeline_mode<synchronous>, transform_indices = @transform_4, window_bounds = array<i64: 160, 1>}, {transform_indices = @transform_5, window_bounds = array<i64: 1, 40, 384>}, {transform_indices = @transform_6, window_bounds = array<i64: 1, 8, 384>}, {transform_indices = @transform_7, window_bounds = array<i64: 1, 4, 384>}, {transform_indices = @transform_8, window_bounds = array<i64: 1, 1, 4, 1>}, {transform_indices = @transform_9, window_bounds = array<i64: 1, 1, 4, 1>}]} {
    %c0 = arith.constant 0 : index
    %c0_0 = arith.constant 0 : index
    %0 = vector.load %arg3[%c0, %c0_0] : memref<8x36xbf16, #tpu.memory_space<vmem>>, vector<8x36xbf16>
    %c0_1 = arith.constant 0 : index
    %c0_2 = arith.constant 0 : index
    %c0_3 = arith.constant 0 : index
    %1 = vector.load %arg2[%c0_1, %c0_2, %c0_3] : memref<1x36x384xbf16, #tpu.memory_space<vmem>>, vector<1x36x384xbf16>
    %2 = vector.shape_cast %1 : vector<1x36x384xbf16> to vector<36x384xbf16>
    %cst = arith.constant dense<0.000000e+00> : vector<8x384xf32>
    %3 = tpu.matmul %0, %2, %cst {dimension_numbers = #tpu.dot_dimension_numbers<[1], [0], [0], [1], [0, 0, 1, 1], [], []>} : vector<8x36xbf16>, vector<36x384xbf16>, vector<8x384xf32> -> vector<8x384xf32>
    %c0_4 = arith.constant 0 : index
    %c0_5 = arith.constant 0 : index
    %4 = vector.load %arg4[%c0_4, %c0_5] : memref<8x1xf32, #tpu.memory_space<vmem>>, vector<8x1xf32>
    %5 = vector.broadcast %4 : vector<8x1xf32> to vector<8x384xf32>
    %6 = arith.addf %3, %5 : vector<8x384xf32>
    %cst_6 = arith.constant 0.000000e+00 : f32
    %7 = vector.broadcast %cst_6 : f32 to vector<8x384xf32>
    %8 = arith.maximumf %6, %7 : vector<8x384xf32>
    %9 = arith.truncf %8 : vector<8x384xf32> to vector<8x384xbf16>
    %c0_7 = arith.constant 0 : index
    %c0_8 = arith.constant 0 : index
    %c0_9 = arith.constant 0 : index
    %10 = vector.load %arg8[%c0_7, %c0_8, %c0_9] : memref<1x8x384xbf16, #tpu.memory_space<vmem>>, vector<1x8x384xbf16>
    %11 = vector.shape_cast %10 : vector<1x8x384xbf16> to vector<8x384xbf16>
    %12 = vector.shape_cast %9 : vector<8x384xbf16> to vector<1x8x384xbf16>
    tpu.vector_store %arg8[%c0_7, %c0_8, %c0_9], %12 {strides = array<i32>} : memref<1x8x384xbf16, #tpu.memory_space<vmem>>, vector<1x8x384xbf16>,
    %c0_10 = arith.constant 0 : index
    %c0_11 = arith.constant 0 : index
    %13 = vector.load %arg5[%c0_10, %c0_11] : memref<160x8xbf16, #tpu.memory_space<vmem>>, vector<160x8xbf16>
    %14 = arith.truncf %8 : vector<8x384xf32> to vector<8x384xbf16>
    %cst_12 = arith.constant dense<0.000000e+00> : vector<160x384xf32>
    %15 = tpu.matmul %13, %14, %cst_12 {dimension_numbers = #tpu.dot_dimension_numbers<[1], [0], [0], [1], [0, 0, 1, 1], [], []>} : vector<160x8xbf16>, vector<8x384xbf16>, vector<160x384xf32> -> vector<160x384xf32>
    %c0_13 = arith.constant 0 : index
    %c0_14 = arith.constant 0 : index
    %16 = vector.load %arg6[%c0_13, %c0_14] : memref<160x1xf32, #tpu.memory_space<vmem>>, vector<160x1xf32>
    %17 = vector.broadcast %16 : vector<160x1xf32> to vector<160x384xf32>
    %18 = arith.addf %15, %17 : vector<160x384xf32>
    %19 = vector.shape_cast %18 : vector<160x384xf32> to vector<4x40x384xf32>
    %c0_15 = arith.constant 0 : index
    %c0_16 = arith.constant 0 : index
    %c0_17 = arith.constant 0 : index
    %20 = vector.load %arg7[%c0_15, %c0_16, %c0_17] : memref<1x40x384xbf16, #tpu.memory_space<vmem>>, vector<1x40x384xbf16>
    %21 = vector.shape_cast %20 : vector<1x40x384xbf16> to vector<40x384xbf16>
    %22 = arith.extf %21 : vector<40x384xbf16> to vector<40x384xf32>
    %23 = vector.shape_cast %22 : vector<40x384xf32> to vector<1x40x384xf32>
    %24 = vector.broadcast %23 : vector<1x40x384xf32> to vector<4x40x384xf32>
    %25 = arith.mulf %19, %24 : vector<4x40x384xf32>
    %cst_18 = arith.constant dense<0.000000e+00> : vector<4x384xf32>
    %26 = vector.multi_reduction <add>, %25, %cst_18 [1] : vector<4x40x384xf32> to vector<4x384xf32>
    %cst_19 = arith.constant 0.000000e+00 : f32
    %27 = vector.broadcast %cst_19 : f32 to vector<4x384xf32>
    %28 = arith.maximumf %26, %27 : vector<4x384xf32>
    %29 = arith.truncf %28 : vector<4x384xf32> to vector<4x384xbf16>
    %c0_20 = arith.constant 0 : index
    %c0_21 = arith.constant 0 : index
    %c0_22 = arith.constant 0 : index
    %30 = vector.load %arg9[%c0_20, %c0_21, %c0_22] : memref<1x4x384xbf16, #tpu.memory_space<vmem>>, vector<1x4x384xbf16>
    %31 = vector.shape_cast %30 : vector<1x4x384xbf16> to vector<4x384xbf16>
    %32 = vector.shape_cast %29 : vector<4x384xbf16> to vector<1x4x384xbf16>
    tpu.vector_store %arg9[%c0_20, %c0_21, %c0_22], %32 {strides = array<i32>} : memref<1x4x384xbf16, #tpu.memory_space<vmem>>, vector<1x4x384xbf16>,
    %cst_23 = arith.constant dense<0.000000e+00> : vector<4xf32>
    %33 = vector.multi_reduction <add>, %28, %cst_23 [1] : vector<4x384xf32> to vector<4xf32>
    %34 = vector.shape_cast %33 : vector<4xf32> to vector<4x1xf32>
    %c0_24 = arith.constant 0 : index
    %c0_25 = arith.constant 0 : index
    %c0_26 = arith.constant 0 : index
    %c0_27 = arith.constant 0 : index
    %35 = vector.load %arg10[%c0_24, %c0_25, %c0_26, %c0_27] : memref<1x1x4x1xf32, #tpu.memory_space<vmem>>, vector<1x1x4x1xf32>
    %36 = vector.shape_cast %35 : vector<1x1x4x1xf32> to vector<4x1xf32>
    %37 = vector.shape_cast %34 : vector<4x1xf32> to vector<1x1x4x1xf32>
    tpu.vector_store %arg10[%c0_24, %c0_25, %c0_26, %c0_27], %37 {strides = array<i32>} : memref<1x1x4x1xf32, #tpu.memory_space<vmem>>, vector<1x1x4x1xf32>,
    %38 = arith.mulf %28, %28 : vector<4x384xf32>
    %cst_28 = arith.constant dense<0.000000e+00> : vector<4xf32>
    %39 = vector.multi_reduction <add>, %38, %cst_28 [1] : vector<4x384xf32> to vector<4xf32>
    %40 = vector.shape_cast %39 : vector<4xf32> to vector<4x1xf32>
    %c0_29 = arith.constant 0 : index
    %c0_30 = arith.constant 0 : index
    %c0_31 = arith.constant 0 : index
    %c0_32 = arith.constant 0 : index
    %41 = vector.load %arg11[%c0_29, %c0_30, %c0_31, %c0_32] : memref<1x1x4x1xf32, #tpu.memory_space<vmem>>, vector<1x1x4x1xf32>
    %42 = vector.shape_cast %41 : vector<1x1x4x1xf32> to vector<4x1xf32>
    %43 = vector.shape_cast %40 : vector<4x1xf32> to vector<1x1x4x1xf32>
    tpu.vector_store %arg11[%c0_29, %c0_30, %c0_31, %c0_32], %43 {strides = array<i32>} : memref<1x1x4x1xf32, #tpu.memory_space<vmem>>, vector<1x1x4x1xf32>,
    return
  }
  func.func @transform_0(%arg0: i32, %arg1: i32) -> (i32, i32, i32) {
    %c0_i32 = arith.constant 0 : i32
    %c0_i32_0 = arith.constant 0 : i32
    return %arg0, %c0_i32, %arg1 : i32, i32, i32
  }
  func.func @transform_1(%arg0: i32, %arg1: i32) -> (i32, i32) {
    %c0_i32 = arith.constant 0 : i32
    %c0_i32_0 = arith.constant 0 : i32
    %c0_i32_1 = arith.constant 0 : i32
    return %c0_i32, %c0_i32_0 : i32, i32
  }
  func.func @transform_2(%arg0: i32, %arg1: i32) -> (i32, i32) {
    %c0_i32 = arith.constant 0 : i32
    %c0_i32_0 = arith.constant 0 : i32
    %c0_i32_1 = arith.constant 0 : i32
    return %c0_i32, %c0_i32_0 : i32, i32
  }
  func.func @transform_3(%arg0: i32, %arg1: i32) -> (i32, i32) {
    %c0_i32 = arith.constant 0 : i32
    %c0_i32_0 = arith.constant 0 : i32
    %c0_i32_1 = arith.constant 0 : i32
    return %c0_i32, %c0_i32_0 : i32, i32
  }
  func.func @transform_4(%arg0: i32, %arg1: i32) -> (i32, i32) {
    %c0_i32 = arith.constant 0 : i32
    %c0_i32_0 = arith.constant 0 : i32
    %c0_i32_1 = arith.constant 0 : i32
    return %c0_i32, %c0_i32_0 : i32, i32
  }
  func.func @transform_5(%arg0: i32, %arg1: i32) -> (i32, i32, i32) {
    %c0_i32 = arith.constant 0 : i32
    %c0_i32_0 = arith.constant 0 : i32
    return %arg0, %c0_i32, %arg1 : i32, i32, i32
  }
  func.func @transform_6(%arg0: i32, %arg1: i32) -> (i32, i32, i32) {
    %c0_i32 = arith.constant 0 : i32
    %c0_i32_0 = arith.constant 0 : i32
    return %arg0, %c0_i32, %arg1 : i32, i32, i32
  }
  func.func @transform_7(%arg0: i32, %arg1: i32) -> (i32, i32, i32) {
    %c0_i32 = arith.constant 0 : i32
    %c0_i32_0 = arith.constant 0 : i32
    return %arg0, %c0_i32, %arg1 : i32, i32, i32
  }
  func.func @transform_8(%arg0: i32, %arg1: i32) -> (i32, i32, i32, i32) {
    %c0_i32 = arith.constant 0 : i32
    %c0_i32_0 = arith.constant 0 : i32
    %c0_i32_1 = arith.constant 0 : i32
    return %arg0, %arg1, %c0_i32, %c0_i32_0 : i32, i32, i32, i32
  }
  func.func @transform_9(%arg0: i32, %arg1: i32) -> (i32, i32, i32, i32) {
    %c0_i32 = arith.constant 0 : i32
    %c0_i32_0 = arith.constant 0 : i32
    %c0_i32_1 = arith.constant 0 : i32
    return %arg0, %arg1, %c0_i32, %c0_i32_0 : i32, i32, i32, i32
  }
}

</mosaic_0001>

<bundles_post_ra>
// kernel: _forward.1
= control target key start
LH: loop header
LB: loop body
LE: loop exit
PB: predicated region body
PF: predicated region fallthrough
CT: control target
= control target key end

     0   :  { %s2095_s30 = smov 0   ;;  %s2097_s10 = smov 0   ;;  %s2593_s0 = inlined_call_operand.vmem [shape: bf16[2,36,384], index: 0, kind: input, shape index: {}]   ;;  %s2594_s1 = inlined_call_operand.vmem [shape: bf16[8,36], index: 1, kind: input, shape index: {}]   ;;  %s2595_s2 = inlined_call_operand.vmem [shape: f32[8,1], index: 2, kind: input, shape index: {}]   ;;  %s2596_s3 = inlined_call_operand.vmem [shape: bf16[160,8], index: 3, kind: input, shape index: {}]   ;;  %s2597_s4 = inlined_call_operand.vmem [shape: f32[160,1], index: 4, kind: input, shape index: {}]   ;;  %s2598_s5 = inlined_call_operand.vmem [shape: bf16[2,40,384], index: 5, kind: input, shape index: {}]   ;;  %s2599_s6 = inlined_call_operand.vmem [shape: bf16[2,8,384], index: 6, kind: output, shape index: {0}]   ;;  %s2600_s7 = inlined_call_operand.vmem [shape: bf16[2,4,384], index: 7, kind: output, shape index: {1}]   ;;  %s2601_s8 = inlined_call_operand.vmem [shape: f32[2,1,4,1], index: 8, kind: output, shape index: {2}]   ;;  %s2602_s9 = inlined_call_operand.vmem [shape: f32[2,1,4,1], index: 9, kind: output, shape index: {3}]  }
   0x1   :  { %s2099_s11 = smov 0  }
   0x2 LB: > { %s32_s12 = sadd.s32 1, %s2035_s10  ;;  %p1851_p0 = scmp.ge.s32.totalorder %s2039_s11, 1  ;;  %s2039_s11 = sphi %s2099_s11, %s20_s11   ;;  %s2035_s10 = sphi %s2097_s10, %s2604_s10   ;;  %s2031_s30 = sphi %s2095_s30, %s2603_s30  }
   0x3   : > { %p34_p1 = scmp.ge.s32.totalorder %s32_s12, 2  ;;  %p338_p2 = scmp.lt.s32.totalorder %s2039_s11, 3 }
   0x5   : > { %s2606_s12 = smov (%p34_p1, %s32_s12), 0  ;;  %p339_p3 = pnand %p1851_p0, %p338_p2 }
   0x6   : > { %p415_p4 = scmp.lt.s32.totalorder (!%p339_p3), %s2031_s30, 1  ;;  %v2041_v0 = vmov (!%p339_p3), 0   ;;  %v480_v1 = vld [vmem:[%s2595_s2] sm:$0xff] (!%p339_p3)  ;;  %v665_v3 = vld [vmem:[%s2597_s4 + $0x30] sm:$0xff] (!%p339_p3)  ;;  %vm530_vm0 = vcmask (!%p339_p3), 1041408   ;;  %v670_v11 = vld [vmem:[%s2597_s4 + $0x58] sm:$0xff] (!%p339_p3) }
   0x7   : > { %342 = sbr.rel (%p339_p3) target bundleno = 712 (0x2c8), region = 44  ;;  %572 = vmatprep.mubr.bf16.mxu1 (!%p339_p3), %v2041_v0  ;;  %1994 = vset.pattern.permute.xlu0 (!%p339_p3), %v2041_v0  ;;  %v659_v2 = vld [vmem:[%s2597_s4] sm:$0xff] (!%p339_p3)  ;;  %v666_v13 = vld [vmem:[%s2597_s4 + $0x38] sm:$0xff] (!%p339_p3)  ;;  %vm526_vm1 = vcmask (!%p339_p3), 293888   ;;  %v2042_v16 = vmov (!%p339_p3), 0.0   ;;  %vm2043_vm2 = vmmov (!%p339_p3), 0  }
   0x8   : > { %483 = vperm.xlu0 (!%p339_p3), %1994, %v480_v1   ;;  %902 = vmatprep.mubr.bf16.mxu0 (!%p339_p3), %v2041_v0  ;;  %v469_v14 = vld [vmem:[%s2594_s1] sm:$0xf] (!%p339_p3)  ;;  %v662_v20 = vld [vmem:[%s2597_s4 + $0x18] sm:$0xff] (!%p339_p3)  ;;  %v676_v22 = vld [vmem:[%s2597_s4 + $0x88] sm:$0xff] (!%p339_p3)  ;;  %vm829_vm3 = vcmask (!%p339_p3), 64512   ;;  %vm860_vm4 = vcmask (!%p339_p3), 1043456  }
   0x9   : > { %1995 = vset.pattern.permute.xlu1 (!%p339_p3), %v2041_v0  ;;  %v675_v17 = vld [vmem:[%s2597_s4 + $0x80] sm:$0xff] (!%p339_p3)  ;;  %v677_v24 = vld [vmem:[%s2597_s4 + $0x90] sm:$0xff] (!%p339_p3)  ;;  %v678_v25 = vld [vmem:[%s2597_s4 + $0x98] sm:$0xff] (!%p339_p3)  ;;  %vm1494_vm5 = vcmask (!%p339_p3), 1041409   ;;  %vm1497_vm6 = vcmask (!%p339_p3), 1042434   ;;  %vm1500_vm7 = vcmask (!%p339_p3), 1043459  }
   0xa   : > { %v663_v23 = vld [vmem:[%s2597_s4 + $0x20] sm:$0xff] (!%p339_p3)  ;;  %v660_v27 = vld [vmem:[%s2597_s4 + $0x8] sm:$0xff] (!%p339_p3)  ;;  %v669_v29 = vld [vmem:[%s2597_s4 + $0x50] sm:$0xff] (!%p339_p3)  ;;  %vm1564_vm8 = vcmask (!%p339_p3), 3072  }
   0xb   : > { %v2007_v26 = vld [vmem:[%s2596_s3] sm:$0xff] (!%p339_p3)   ;;  %686 = vperm.xlu1 (!%p339_p3), %1995, %v660_v27   ;;  %v664_v28 = vld [vmem:[%s2597_s4 + $0x28] sm:$0xff] (!%p339_p3)  ;;  %v661_v30 = vld [vmem:[%s2597_s4 + $0x10] sm:$0xff] (!%p339_p3) }
   0xc   : > { %681 = vperm.xlu0 (!%p339_p3), %1994, %v659_v2   ;;  %v674_v31 = vld [vmem:[%s2597_s4 + $0x78] sm:$0xff] (!%p339_p3)  ;;  %v671_v32 = vld [vmem:[%s2597_s4 + $0x60] sm:$0xff] (!%p339_p3)  ;;  %v672_v34 = vld [vmem:[%s2597_s4 + $0x68] sm:$0xff] (!%p339_p3) }
   0xd   : > { %v667_v33 = vld [vmem:[%s2597_s4 + $0x40] sm:$0xff] (!%p339_p3)  ;;  %v668_v35 = vld [vmem:[%s2597_s4 + $0x48] sm:$0xff] (!%p339_p3)  ;;  %v673_v36 = vld [vmem:[%s2597_s4 + $0x70] sm:$0xff] (!%p339_p3) }
   0xe   : > { %s2608_s30 = smov (!%p415_p4, %s2031_s30), 1  ;;  %v2008_v56 = vld [vmem:[%s2596_s3 + $0x8] sm:$0xff]   ;;  %v2009_v59 = vld [vmem:[%s2596_s3 + $0x10] sm:$0xff]   ;;  %v2010_v60 = vld [vmem:[%s2596_s3 + $0x18] sm:$0xff]  }
   0xf   : > { %s1963_s17 = smul.u32 60, %s2608_s30  ;;  %706 = vperm.xlu1 %1995, %v664_v28   ;;  %v2011_v61 = vld [vmem:[%s2596_s3 + $0x20] sm:$0xff]   ;;  %v2012_v62 = vld [vmem:[%s2596_s3 + $0x28] sm:$0xff]   ;;  %v2013_v63 = vld [vmem:[%s2596_s3 + $0x30] sm:$0xff]   ;;  %s1856_s27 = sshll.u32 %s2608_s30, 2 }
  0x10   : > { %711 = vperm.xlu0 %1994, %v665_v3   ;;  %s1964_s14 = smul.u32 12, %s2608_s30  ;;  %v2014_v1 = vld [vmem:[%s2596_s3 + $0x38] sm:$0xff]   ;;  %v2015_v2 = vld [vmem:[%s2596_s3 + $0x40] sm:$0xff]   ;;  %v2016_v3 = vld [vmem:[%s2596_s3 + $0x48] sm:$0xff]   ;;  %s460_s13 = scalar_lea.vmem %s2601_s8, %s1856_s27 }
  0x11   : > { %s2134_s22 = scalar_lea.vmem %s2593_s0, %s1963_s17  ;;  %s2288_s23 = scalar_lea.vmem %s2598_s5, %s1963_s17 }
  0x12   : > { %v1996_v4 = vld [vmem:[%s2134_s22 + $0x4] ss:$12 sps:$4 sm:$0xff]   ;;  %v1998_v5 = vld [vmem:[%s2134_s22] ss:$12 sps:$4 sm:$0xff]   ;;  %v1999_v6 = vld [vmem:[%s2134_s22 + $0x1c] ss:$12 sps:$4 sm:$0xff]   ;;  %s442_s18 = scalar_lea.vmem %s2599_s6, %s1964_s14  ;;  %s467_s16 = scalar_lea.vmem %s2602_s9, %s1856_s27 }
  0x13   : > { %540 = vmatprep.subr.bf16.mxu1 %v1996_v4  ;;  %v478_v7 = vld [vmem:[%s2134_s22 + $0x30] sm:$0x33]  ;;  %v2001_v8 = vld [vmem:[%s2134_s22 + $0x18] ss:$12 sps:$4 sm:$0xff]   ;;  %v2005_v18 = vld [vmem:[%s2134_s22 + $0x20] ss:$12 sps:$4 sm:$0xff]   ;;  %731 = vperm.xlu1 %1995, %v669_v29  }
  0x14   : > { %541 = vmatpush1.bf16.msra.mxu1 %v1998_v5  ;;  %v1864_v9 = vcombine.low %v478_v7, %v478_v7  ;;  %v1865_v10 = vcombine.high %v478_v7, %v478_v7  ;;  %736 = vperm.xlu0 %1994, %v670_v11   ;;  %v2004_v15 = vld [vmem:[%s2134_s22 + $0x8] ss:$12 sps:$4 sm:$0xff]   ;;  %v2006_v19 = vld [vmem:[%s2134_s22 + $0x38] ss:$0 sps:$4 sm:$0x33]   ;;  %s1965_s17 = smul.u32 6, %s2608_s30 }
  0x15   : > { %542 = vmatprep.subr.bf16.mxu1 %v1999_v6  ;;  %v538_v21 = vsel %vm530_vm0, %v2006_v19, 0  ;;  %v1120_v29 = vld [vmem:[%s2288_s23 + $0x18] sm:$0xff] }
  0x16   : > { %v532_v12 = vsel %vm530_vm0, %v1864_v9, 0  ;;  %s452_s26 = scalar_lea.vmem %s2600_s7, %s1965_s17 }
  0x17   : > { %691 = vperm.xlu1 %1995, %v661_v30  }
  0x18   : > { %543 = vmatpush1.bf16.msra.mxu1 %v2001_v8  ;;  %716 = vperm.xlu0 %1994, %v666_v13  }
  0x19   : > { %1867 = vmatprep.subr.msk.bf16.mxu1 %vm530_vm0, %v1865_v10 }
  0x1b   : > { %756 = vperm.xlu1 %1995, %v674_v31  }
  0x1c   : > { %545 = vmatpush1.bf16.msra.mxu1 %v532_v12  ;;  %761 = vperm.xlu0 %1994, %v675_v17   ;;  %v1118_v12 = vld [vmem:[%s2288_s23 + $0xc] sm:$0xff] }
  0x1d   : > { %1930 = vmatprep.subr.bf16.mxu1 %v2042_v16 }
  0x1f   : > { %1868 = vmatmul.mubr.msk.bf16.vlgmr.msra.gmra.mrb[0].mxu1 %vm526_vm1, %v469_v14  ;;  %741 = vperm.xlu1 %1995, %v671_v32   ;;  %v1122_v32 = vld [vmem:[%s2288_s23 + $0x24] sm:$0xff] }
  0x20   : > { %1931 = vmatpush3.bf16.msra.mxu1 %v2004_v15  ;;  %1936 = vmatprep.mubr.msk.bf16.mxu1 %vm2043_vm2, %v2042_v16 }
  0x21   : > { %1932 = vmatprep.subr.bf16.mxu1 %v2042_v16  ;;  %696 = vperm.xlu0 %1994, %v662_v20  }
  0x23   : > { %721 = vperm.xlu1 %1995, %v667_v33  }
  0x24   : > { %1933 = vmatpush3.bf16.msra.mxu1 %v2005_v18  ;;  %v2300_v18 = vunpack.c.l.bf16 %v1118_v12 }
  0x25   : > { %1934 = vmatprep.subr.bf16.mxu1 %v2042_v16  ;;  %766 = vperm.xlu0 %1994, %v676_v22  }
  0x27   : > { %746 = vperm.xlu1 %1995, %v672_v34  }
  0x28   : > { %1935 = vmatpush3.bf16.msra.mxu1 %v538_v21  ;;  %v2302_v21 = vunpack.c.h.bf16 %v1118_v12 }
  0x29   : > { %701 = vperm.xlu0 %1994, %v663_v23  }
  0x2b   : > { %1937 = vmatmul.mubr.msk.bf16.vlgmr.msra.gmra.mrb[4].mxu1 %vm526_vm1, %v469_v14  ;;  %726 = vperm.xlu1 %1995, %v668_v35   ;;  %v2314_v35 = vunpack.c.l.bf16 %v1120_v29 }
  0x2c   : > { %1942 = vmatprep.mubr.msk.bf16.mxu1 %vm829_vm3, %v2007_v26 }
  0x2d   : > { %771 = vperm.xlu0 %1994, %v677_v24  }
  0x2f   : > { %751 = vperm.xlu1 %1995, %v673_v36   ;;  %v1121_v36 = vld [vmem:[%s2288_s23 + $0x8] ss:$24 sps:$4 sm:$0xff]  }
  0x31   : > { %776 = vperm.xlu0 %1994, %v678_v25  }
  0x87   : > { %v484_v37 = vpop.permute.xlu0 %483 }
  0x8a   : > { %v2275_v6 = vpop.permute.xlu1 %686 }
  0x8b   : > { %v682_v4 = vpop.permute.xlu0 %681 }
  0x8e   : > { %v2279_v8 = vpop.permute.xlu1 %706 }
  0x8f   : > { %v2273_v5 = vpop.permute.xlu0 %711 }
  0x92   : > { %v2291_v10 = vpop.permute.xlu1 %731 }
  0x93   : > { %v2277_v7 = vpop.permute.xlu0 %736 }
  0x96   : > { %v692_v22 = vpop.permute.xlu1 %691 }
  0x97   : > { %v2281_v9 = vpop.permute.xlu0 %716 }
  0x9a   : > { %v2312_v33 = vpop.permute.xlu1 %756 }
  0x9b   : > { %v2293_v11 = vpop.permute.xlu0 %761 }
  0xf2   : > { %v574_v38 = vpop.f32.mrb[0].mxu1 }
  0xf3   : > { %v575_v39 = vadd.f32 %v574_v38, %v484_v37  ;;  %v576_v40 = vpop.f32.mrb[1].mxu1 }
  0xf4   : > { %v577_v41 = vadd.f32 %v576_v40, %v484_v37  ;;  %v578_v42 = vpop.f32.mrb[2].mxu1  ;;  %v1123_v40 = vld [vmem:[%s2288_s23 + $0x14] ss:$24 sps:$4 sm:$0xff]  }
  0xf5   : > { %v621_v43 = vmax.f32 %v575_v39, 0.0  ;;  %v579_v44 = vpop.f32.mrb[3].mxu1  ;;  %v2317_v39 = vunpack.c.h.bf16 %v1120_v29 }
  0xf6   : > { %v622_v45 = vmax.f32 %v577_v41, 0.0 }
  0xf7   : > { %v624_v46 = vpack.c.bf16 %v621_v43, %v621_v43 }
  0xf8   : > { %v1913_v47 = vpack.c.bf16 %v622_v45, %v621_v43  ;;  %v625_v48 = vpack.c.bf16 %v622_v45, %v622_v45  ;;  %v2320_v43 = vunpack.c.l.bf16 %v1122_v32 }
  0xf9   : > { %v862_v49 = vsel %vm860_vm4, %v624_v46, 0 }
  0xfa   : > { %637 = vst [vmem:[%s442_s18] sm:$0xff] %v1913_v47  ;;  %1882 = vmatprep.subr.msk.bf16.mxu0 %vm860_vm4, %v625_v48  ;;  %v2324_v47 = vunpack.c.h.bf16 %v1122_v32  ;;  %v2326_v48 = vunpack.c.h.bf16 %v1121_v36 }
  0xfb   : > { %871 = vmatpush1.bf16.msra.mxu0 %v862_v49  ;;  %v2328_v49 = vunpack.c.l.bf16 %v1121_v36 }
  0xfe   : > { %v615_v50 = vpop.f32.mrb[4].mxu1  ;;  %1883 = vmatmul.mubr.msk.bf16.vlgmr.msra.gmra.mrb[0].mxu0 %vm829_vm3, %v2007_v26  ;;  %v697_v26 = vpop.permute.xlu0 %696 }
  0xff   : > { %v616_v51 = vadd.f32 %v615_v50, %v484_v37  ;;  %912 = vmatprep.mubr.bf16.mxu0 %v2041_v0  ;;  %v1938_v52 = vpop.f32.mrb[5].mxu1  ;;  %v1124_v50 = vld [vmem:[%s2288_s23 + $0x30] sm:$0xff] }
 0x100   : > { %v618_v53 = vpop.f32.mrb[6].mxu1 }
 0x101   : > { %v623_v54 = vmax.f32 %v616_v51, 0.0  ;;  %v1939_v55 = vpop.f32.mrb[7].mxu1 }
 0x102   : > { %v2322_v44 = vpop.permute.xlu0 %766  ;;  %v2332_v55 = vunpack.c.h.bf16 %v1123_v40 }
 0x103   : > { %v626_v57 = vpack.c.bf16 %v623_v54, %v623_v54 }
 0x105   : > { %638 = vst [vmem:[%s442_s18 + $0x8] sm:$0xf] %v626_v57  ;;  %1962 = vmatprep.subr.msk.bf16.mxu1 %vm860_vm4, %v626_v57  ;;  %v868_v58 = vsel %vm860_vm4, %v626_v57, 0 }
 0x106   : > { %1884 = vmatmul.mubr.msk.bf16.gmra.mrb[4].mxu0 %vm829_vm3, %v2008_v56  ;;  %1941 = vmatpush3.bf16.msra.mxu1 %v868_v58 }
 0x107   : > { %922 = vmatprep.mubr.bf16.mxu0 %v2041_v0 }
 0x109   : > { %1943 = vmatmul.mubr.msk.bf16.vlgmr.msra.gmra.mrb[8].mxu1 %vm829_vm3, %v2008_v56  ;;  %v2334_v56 = vunpack.c.l.bf16 %v1123_v40 }
 0x10a   : > { %1946 = vmatprep.mubr.msk.bf16.mxu1 %vm829_vm3, %v2009_v59 }
 0x10e   : > { %1885 = vmatmul.mubr.msk.bf16.gmra.mrb[8].mxu0 %vm829_vm3, %v2009_v59 }
 0x10f   : > { %932 = vmatprep.mubr.bf16.mxu0 %v2041_v0 }
 0x111   : > { %1947 = vmatmul.mubr.msk.bf16.gmra.mrb[12].mxu1 %vm829_vm3, %v2010_v60 }
 0x112   : > { %1950 = vmatprep.mubr.msk.bf16.mxu1 %vm829_vm3, %v2011_v61 }
 0x116   : > { %1886 = vmatmul.mubr.msk.bf16.gmra.mrb[12].mxu0 %vm829_vm3, %v2010_v60 }
 0x117   : > { %942 = vmatprep.mubr.bf16.mxu0 %v2041_v0 }
 0x119   : > { %1951 = vmatmul.mubr.msk.bf16.gmra.mrb[16].mxu1 %vm829_vm3, %v2012_v62 }
 0x11a   : > { %1954 = vmatprep.mubr.msk.bf16.mxu1 %vm829_vm3, %v2013_v63 }
 0x11e   : > { %1887 = vmatmul.mubr.msk.bf16.gmra.mrb[16].mxu0 %vm829_vm3, %v2011_v61  ;;  %v2337_v61 = vpop.permute.xlu1 %741 }
 0x11f   : > { %952 = vmatprep.mubr.bf16.mxu0 %v2041_v0 }
 0x121   : > { %1955 = vmatmul.mubr.msk.bf16.gmra.mrb[20].mxu1 %vm829_vm3, %v2014_v1 }
 0x122   : > { %1958 = vmatprep.mubr.msk.bf16.mxu1 %vm829_vm3, %v2015_v2 }
 0x126   : > { %1888 = vmatmul.mubr.msk.bf16.gmra.mrb[20].mxu0 %vm829_vm3, %v2012_v62 }
 0x127   : > { %962 = vmatprep.mubr.bf16.mxu0 %v2041_v0 }
 0x129   : > { %1959 = vmatmul.mubr.msk.bf16.gmra.mrb[24].mxu1 %vm829_vm3, %v2016_v3 }
 0x12e   : > { %1889 = vmatmul.mubr.msk.bf16.gmra.mrb[24].mxu0 %vm829_vm3, %v2013_v63 }
 0x12f   : > { %972 = vmatprep.mubr.bf16.mxu0 %v2041_v0 }
 0x136   : > { %1890 = vmatmul.mubr.msk.bf16.gmra.mrb[28].mxu0 %vm829_vm3, %v2014_v1 }
 0x137   : > { %982 = vmatprep.mubr.bf16.mxu0 %v2041_v0 }
 0x13e   : > { %1891 = vmatmul.mubr.msk.bf16.gmra.mrb[32].mxu0 %vm829_vm3, %v2015_v2 }
 0x13f   : > { %992 = vmatprep.mubr.bf16.mxu0 %v2041_v0  ;;  %v1116_v0 = vld [vmem:[%s2288_s23] sm:$0xff] }
 0x140   : > { %v2296_v13 = vunpack.c.l.bf16 %v1116_v0  ;;  %v2298_v15 = vunpack.c.h.bf16 %v1116_v0 }
 0x146   : > { %1892 = vmatmul.mubr.msk.bf16.gmra.mrb[36].mxu0 %vm829_vm3, %v2016_v3  ;;  %v2340_v3 = vunpack.c.l.bf16 %v1124_v50 }
 0x1d1   : > { %v904_v14 = vpop.f32.mrb[0].mxu0 }
 0x1d2   : > { %v905_v16 = vadd.f32 %v904_v14, %v682_v4  ;;  %v906_v17 = vpop.f32.mrb[1].mxu0 }
 0x1d3   : > { %v907_v19 = vadd.f32 %v906_v17, %v682_v4  ;;  %v908_v20 = vpop.f32.mrb[2].mxu0 }
 0x1d4   : > { %v1141_v23 = vmul.f32 %v2296_v13, %v905_v16  ;;  %v909_v24 = vadd.f32 %v908_v20, %v2275_v6  ;;  %v910_v25 = vpop.f32.mrb[3].mxu0 }
 0x1d5   : > { %v1142_v27 = vmul.f32 %v2298_v15, %v907_v19  ;;  %v911_v28 = vadd.f32 %v910_v25, %v2275_v6  ;;  %v1125_v25 = vld [vmem:[%s2288_s23 + $0x38] sm:$0xf] }
 0x1d6   : > { %v1144_v30 = vmul.f32 %v2300_v18, %v909_v24 }
 0x1d7   : > { %v1145_v31 = vmul.f32 %v2302_v21, %v911_v28 }
 0x1d8   : > { %v1201_v34 = vadd.f32 %v1144_v30, %v1141_v23  ;;  %v2044_v23 = vmov 1983009808   ;;  %v2348_v30 = vunpack.c.h.bf16 %v1124_v50 }
 0x1d9   : > { %v1211_v37 = vadd.f32 %v1145_v31, %v1142_v27  ;;  %v914_v38 = vpop.f32.mrb[4].mxu0  ;;  %v1359_v24 = vunpack.c.l.s4 %v2044_v23  ;;  %v702_v27 = vpop.permute.xlu0 %701  ;;  %v1361_v31 = vlaneseq }
 0x1da   : > { %v915_v41 = vadd.f32 %v914_v38, %v692_v22  ;;  %v916_v42 = vpop.f32.mrb[5].mxu0  ;;  %v2351_v38 = vunpack.c.l.bf16 %v1125_v25 }
 0x1db   : > { %v917_v45 = vadd.f32 %v916_v42, %v692_v22  ;;  %v918_v46 = vpop.f32.mrb[6].mxu0  ;;  %v1360_v42 = vunpack.c.0.s8 %v1359_v24 }
 0x1dc   : > { %v1147_v51 = vmul.f32 %v2314_v35, %v915_v41  ;;  %v919_v52 = vadd.f32 %v918_v46, %v697_v26  ;;  %v920_v53 = vpop.f32.mrb[7].mxu0  ;;  %v1944_v54 = vpop.f32.mrb[8].mxu1 }
 0x1dd   : > { %v1148_v57 = vmul.f32 %v2317_v39, %v917_v45  ;;  %v921_v58 = vadd.f32 %v920_v53, %v697_v26  ;;  %v1046_v59 = vadd.f32 %v1944_v54, %v692_v22  ;;  %v1037_v60 = vpop.f32.mrb[9].mxu1 }
 0x1de   : > { %v1202_v62 = vadd.f32 %v1201_v34, %v1147_v51  ;;  %v1150_v63 = vmul.f32 %v2320_v43, %v919_v52  ;;  %v1038_v1 = vadd.f32 %v1037_v60, %v682_v4  ;;  %v1945_v2 = vpop.f32.mrb[10].mxu1  ;;  %v1362_v52 = vshrl.u32 %v1361_v31, 7 }
 0x1df   : > { %v1212_v0 = vadd.f32 %v1211_v37, %v1148_v57  ;;  %v1151_v12 = vmul.f32 %v2324_v47, %v921_v58  ;;  %v1149_v14 = vmul.f32 %v2326_v48, %v1046_v59  ;;  %v1049_v16 = vadd.f32 %v1945_v2, %v697_v26  ;;  %v1040_v17 = vpop.f32.mrb[11].mxu1 }
 0x1e0   : > { %v1203_v19 = vadd.f32 %v1202_v62, %v1150_v63  ;;  %v1143_v20 = vmul.f32 %v2328_v49, %v1038_v1  ;;  %v1041_v22 = vadd.f32 %v1040_v17, %v2275_v6  ;;  %v2353_v6 = vpop.permute.xlu1 %721 }
 0x1e1   : > { %v1213_v4 = vadd.f32 %v1212_v0, %v1151_v12  ;;  %v1152_v28 = vmul.f32 %v2332_v55, %v1049_v16  ;;  %v924_v29 = vpop.f32.mrb[8].mxu0 }
 0x1e2   : > { %v1146_v32 = vmul.f32 %v2334_v56, %v1041_v22  ;;  %v925_v26 = vadd.f32 %v924_v29, %v702_v27  ;;  %v926_v34 = vpop.f32.mrb[9].mxu0 }
 0x1e3   : > { %v927_v36 = vadd.f32 %v926_v34, %v702_v27  ;;  %v928_v37 = vpop.f32.mrb[10].mxu0  ;;  %v2371_v34 = vsub.s32 %v1360_v42, %v1362_v52 }
 0x1e4   : > { %v1221_v40 = vadd.f32 %v1146_v32, %v1143_v20  ;;  %v1153_v41 = vmul.f32 %v2340_v3, %v925_v26  ;;  %v929_v45 = vadd.f32 %v928_v37, %v2279_v8  ;;  %v930_v46 = vpop.f32.mrb[11].mxu0  ;;  %v1948_v50 = vpop.f32.mrb[12].mxu1 }
 0x1e5   : > { %v1154_v51 = vmul.f32 %v2348_v30, %v927_v36  ;;  %v931_v53 = vadd.f32 %v930_v46, %v2279_v8  ;;  %v1062_v54 = vadd.f32 %v1948_v50, %v2273_v5  ;;  %v1053_v57 = vpop.f32.mrb[13].mxu1  ;;  %v2369_v32 = vpop.permute.xlu1 %746 }
 0x1e6   : > { %v1222_v58 = vadd.f32 %v1221_v40, %v1149_v14  ;;  %v1204_v59 = vadd.f32 %v1203_v19, %v1153_v41  ;;  %v1156_v60 = vmul.f32 %v2296_v13, %v929_v45  ;;  %v1054_v62 = vadd.f32 %v1053_v57, %v702_v27  ;;  %v1949_v63 = vpop.f32.mrb[14].mxu1 }
 0x1e7   : > { %v1214_v1 = vadd.f32 %v1213_v4, %v1154_v51  ;;  %v1157_v2 = vmul.f32 %v2298_v15, %v931_v53  ;;  %v1161_v0 = vmul.f32 %v2334_v56, %v1062_v54  ;;  %v1065_v12 = vadd.f32 %v1949_v63, %v2281_v9  ;;  %v1056_v16 = vpop.f32.mrb[15].mxu1 }
 0x1e8   : > { %v1205_v17 = vrot.slane %v1204_v59, 4  ;;  %v1155_v20 = vmul.f32 %v2351_v38, %v1054_v62  ;;  %v1223_v22 = vadd.f32 %v1222_v58, %v1152_v28  ;;  %v1057_v23 = vadd.f32 %v1056_v16, %v2279_v8 }
 0x1e9   : > { %v1215_v14 = vrot.slane %v1214_v1, 4  ;;  %v1164_v19 = vmul.f32 %v2326_v48, %v1065_v12  ;;  %v934_v24 = vpop.f32.mrb[12].mxu0 }
 0x1ea   : > { %v1206_v25 = vadd.f32 %v1205_v17, %v1204_v59  ;;  %v1224_v27 = vadd.f32 %v1223_v22, %v1155_v20  ;;  %v1158_v4 = vmul.f32 %v2328_v49, %v1057_v23  ;;  %v935_v29 = vadd.f32 %v934_v24, %v2273_v5  ;;  %v936_v31 = vpop.f32.mrb[13].mxu0  ;;  %v727_v22 = vpop.permute.xlu1 %726 }
 0x1eb   : > { %v1216_v26 = vadd.f32 %v1215_v14, %v1214_v1  ;;  %v937_v28 = vadd.f32 %v936_v31, %v2273_v5  ;;  %v938_v36 = vpop.f32.mrb[14].mxu0 }
 0x1ec   : > { %v1207_v8 = vrot.slane %v1206_v25, 2  ;;  %v1225_v37 = vrot.slane %v1224_v27, 4  ;;  %v1251_v40 = vadd.f32 %v1161_v0, %v1158_v4  ;;  %v1159_v41 = vmul.f32 %v2300_v18, %v935_v29  ;;  %v940_v45 = vpop.f32.mrb[15].mxu0  ;;  %v1952_v46 = vpop.f32.mrb[16].mxu1 }
 0x1ed   : > { %v1217_v50 = vrot.slane %v1216_v26, 2  ;;  %v1160_v51 = vmul.f32 %v2302_v21, %v937_v28  ;;  %v939_v53 = vadd.f32 %v938_v36, %v2281_v9  ;;  %v941_v54 = vadd.f32 %v940_v45, %v2281_v9  ;;  %v1069_v57 = vpop.f32.mrb[17].mxu1 }
 0x1ee   : > { %v1208_v42 = vadd.f32 %v1207_v8, %v1206_v25  ;;  %v1226_v52 = vadd.f32 %v1225_v37, %v1224_v27  ;;  %v1231_v58 = vadd.f32 %v1159_v41, %v1156_v60  ;;  %v1078_v5 = vadd.f32 %v1952_v46, %v2291_v10  ;;  %v1953_v59 = vpop.f32.mrb[18].mxu1 }
 0x1ef   : > { %v1218_v62 = vadd.f32 %v1217_v50, %v1216_v26  ;;  %v1241_v63 = vadd.f32 %v1160_v51, %v1157_v2  ;;  %v1162_v1 = vmul.f32 %v2314_v35, %v939_v53  ;;  %v1163_v0 = vmul.f32 %v2317_v39, %v941_v54  ;;  %v1072_v12 = vpop.f32.mrb[19].mxu1 }
 0x1f0   : > { %v1209_v16 = vrot.slane %v1208_v42, 1  ;;  %v1227_v17 = vrot.slane %v1226_v52, 2  ;;  %v1173_v20 = vmul.f32 %v2328_v49, %v1078_v5  ;;  %v1070_v9 = vadd.f32 %v1069_v57, %v2353_v6 }
 0x1f1   : > { %v1219_v23 = vrot.slane %v1218_v62, 1  ;;  %v1232_v14 = vadd.f32 %v1231_v58, %v1162_v1  ;;  %v1242_v60 = vadd.f32 %v1241_v63, %v1163_v0  ;;  %v1252_v24 = vadd.f32 %v1251_v40, %v1164_v19  ;;  %v944_v25 = vpop.f32.mrb[16].mxu0 }
 0x1f2   : > { %v1210_v27 = vadd.f32 %v1209_v16, %v1208_v42  ;;  %v1228_v4 = vadd.f32 %v1227_v17, %v1226_v52  ;;  %v1167_v2 = vmul.f32 %v2332_v55, %v1070_v9  ;;  %v1081_v29 = vadd.f32 %v1953_v59, %v2277_v7  ;;  %v946_v31 = vpop.f32.mrb[17].mxu0 }
 0x1f3   : > { %v1220_v26 = vadd.f32 %v1219_v23, %v1218_v62  ;;  %v1073_v28 = vadd.f32 %v1072_v12, %v727_v22  ;;  %v945_v36 = vadd.f32 %v944_v25, %v2353_v6  ;;  %v947_v8 = vadd.f32 %v946_v31, %v2353_v6  ;;  %v948_v37 = vpop.f32.mrb[18].mxu0  ;;  %v2395_v62 = vpop.permute.xlu1 %751 }
 0x1f4   : > { %v2387_v41 = vmax.f32 %v1210_v27, 0.0  ;;  %v1229_v45 = vrot.slane %v1228_v4, 1  ;;  %v1253_v46 = vadd.f32 %v1252_v24, %v1167_v2  ;;  %v1176_v19 = vmul.f32 %v2334_v56, %v1081_v29  ;;  %v950_v40 = vpop.f32.mrb[19].mxu0  ;;  %v1956_v50 = vpop.f32.mrb[20].mxu1 }
 0x1f5   : > { %v2390_v51 = vmax.f32 %v1220_v26, 0.0  ;;  %v1170_v53 = vmul.f32 %v2351_v38, %v1073_v28  ;;  %v1165_v54 = vmul.f32 %v2320_v43, %v945_v36  ;;  %v1166_v57 = vmul.f32 %v2324_v47, %v947_v8  ;;  %v1085_v42 = vpop.f32.mrb[21].mxu1 }
 0x1f6   : > { %v1230_v52 = vadd.f32 %v1229_v45, %v1228_v4  ;;  %v1281_v6 = vadd.f32 %v1176_v19, %v1173_v20  ;;  %v949_v58 = vadd.f32 %v948_v37, %v727_v22  ;;  %v951_v5 = vadd.f32 %v950_v40, %v727_v22  ;;  %v1957_v59 = vpop.f32.mrb[22].mxu1 }
 0x1f7   : > { %v1903_v63 = vpack.c.bf16 %v2390_v51, %v2387_v41  ;;  %v1254_v1 = vadd.f32 %v1253_v46, %v1170_v53  ;;  %v1233_v0 = vadd.f32 %v1232_v14, %v1165_v54  ;;  %v1243_v12 = vadd.f32 %v1242_v60, %v1166_v57  ;;  %v1088_v16 = vpop.f32.mrb[23].mxu1 }
 0x1f8   : > { %v2399_v17 = vmax.f32 %v1230_v52, 0.0  ;;  %v1168_v9 = vmul.f32 %v2340_v3, %v949_v58  ;;  %v1169_v23 = vmul.f32 %v2348_v30, %v951_v5  ;;  %v1086_v20 = vadd.f32 %v1085_v42, %v2337_v61 }
 0x1f9   : > { %v1364_v22 = vrot.slane %v1903_v63, %v2371_v34  ;;  %v1255_v24 = vrot.slane %v1254_v1, 4  ;;  %v1097_v25 = vadd.f32 %v1957_v59, %v2312_v33  ;;  %v1094_v27 = vadd.f32 %v1956_v50, %v2395_v62  ;;  %v954_v4 = vpop.f32.mrb[20].mxu0 }
 0x1fa   : > { %v1335_v14 = vpack.c.bf16 %v2399_v17, %v2399_v17  ;;  %v1234_v60 = vadd.f32 %v1233_v0, %v1168_v9  ;;  %v1244_v2 = vadd.f32 %v1243_v12, %v1169_v23  ;;  %v1179_v29 = vmul.f32 %v2326_v48, %v1086_v20  ;;  %v956_v31 = vpop.f32.mrb[21].mxu0  ;;  %v2421_v23 = vpop.permute.xlu0 %771 }
 0x1fb   : > { %v1256_v26 = vadd.f32 %v1255_v24, %v1254_v1  ;;  %v2411_v28 = vmul.f32 %v2328_v49, %v1097_v25  ;;  %v1185_v36 = vmul.f32 %v2351_v38, %v1094_v27  ;;  %v1089_v8 = vadd.f32 %v1088_v16, %v2369_v32  ;;  %v958_v37 = vpop.f32.mrb[22].mxu0 }
 0x1fc   : > { %v1371_v45 = vrot.slane %v1335_v14, %v2371_v34  ;;  %v1235_v46 = vrot.slane %v1234_v60, 4  ;;  %v1245_v19 = vrot.slane %v1244_v2, 4  ;;  %v1282_v40 = vadd.f32 %v1281_v6, %v1179_v29  ;;  %v960_v50 = vpop.f32.mrb[23].mxu0  ;;  %v1960_v53 = vpop.f32.mrb[24].mxu1 }
 0x1fd   : > { %v1257_v54 = vrot.slane %v1256_v26, 2  ;;  %v1182_v57 = vmul.f32 %v2332_v55, %v1089_v8  ;;  %v955_v42 = vadd.f32 %v954_v4, %v2291_v10  ;;  %v957_v49 = vadd.f32 %v956_v31, %v2291_v10  ;;  %v1101_v52 = vpop.f32.mrb[25].mxu1 }
 0x1fe   : > { %v1372_v58 = vcombine.low %v1364_v22, %v1371_v45  ;;  %v1907_v5 = vcombine.low %v1371_v45, %v1371_v45  ;;  %v1236_v59 = vadd.f32 %v1235_v46, %v1234_v60  ;;  %v1246_v63 = vadd.f32 %v1245_v19, %v1244_v2  ;;  %v1961_v1 = vpop.f32.mrb[26].mxu1 }
 0x1ff   : > { %v1258_v0 = vadd.f32 %v1257_v54, %v1256_v26  ;;  %v1283_v12 = vadd.f32 %v1282_v40, %v1182_v57  ;;  %v1171_v16 = vmul.f32 %v2296_v13, %v955_v42  ;;  %v1172_v6 = vmul.f32 %v2298_v15, %v957_v49  ;;  %v1104_v9 = vpop.f32.mrb[27].mxu1 }
 0x200   : > { %v2424_v20 = vrot.slane %v1372_v58, %v2371_v34  ;;  %v2427_v10 = vrot.slane %v1907_v5, %v2371_v34  ;;  %v1237_v22 = vrot.slane %v1236_v59, 2  ;;  %v1247_v24 = vrot.slane %v1246_v63, 2 }
 0x201   : > { %v1259_v25 = vrot.slane %v1258_v0, 1  ;;  %v1284_v27 = vadd.f32 %v1283_v12, %v1185_v36  ;;  %v959_v4 = vadd.f32 %v958_v37, %v2277_v7  ;;  %v961_v14 = vadd.f32 %v960_v50, %v2277_v7  ;;  %v964_v60 = vpop.f32.mrb[24].mxu0 }
 0x202   : > { %v1481_v2 = vunpack.c.l.b16 %v2424_v20  ;;  %v1482_v29 = vunpack.c.h.b16 %v2424_v20  ;;  %v1483_v31 = vunpack.c.l.b16 %v2427_v10  ;;  %v1238_v26 = vadd.f32 %v1237_v22, %v1236_v59  ;;  %v966_v8 = vpop.f32.mrb[25].mxu0  ;;  %v2440_v59 = vpop.permute.xlu0 %776 }
 0x203   : > { %v1260_v45 = vadd.f32 %v1259_v25, %v1258_v0  ;;  %v1248_v46 = vadd.f32 %v1247_v24, %v1246_v63  ;;  %v1285_v19 = vrot.slane %v1284_v27, 4  ;;  %v1174_v40 = vmul.f32 %v2300_v18, %v959_v4  ;;  %v968_v54 = vpop.f32.mrb[26].mxu0 }
 0x204   : > { %v1239_v36 = vrot.slane %v1238_v26, 1  ;;  %v1175_v37 = vmul.f32 %v2302_v21, %v961_v14  ;;  %v1110_v7 = vadd.f32 %v1960_v53, %v2421_v23  ;;  %v1102_v50 = vadd.f32 %v1101_v52, %v2293_v11  ;;  %v970_v57 = vpop.f32.mrb[27].mxu0 }
 0x205   : > { %v2438_v42 = vmax.f32 %v1260_v45, 0.0  ;;  %v1249_v49 = vrot.slane %v1248_v46, 1  ;;  %v1286_v58 = vadd.f32 %v1285_v19, %v1284_v27  ;;  %v1261_v5 = vadd.f32 %v1174_v40, %v1171_v16 }
 0x206   : > { %v1240_v63 = vadd.f32 %v1239_v36, %v1238_v26  ;;  %v1271_v0 = vadd.f32 %v1175_v37, %v1172_v6  ;;  %v1197_v12 = vmul.f32 %v2332_v55, %v1110_v7  ;;  %v1191_v22 = vmul.f32 %v2334_v56, %v1102_v50 }
 0x207   : > { %v1338_v24 = vpack.c.bf16 %v2438_v42, %v2438_v42  ;;  %v1250_v53 = vadd.f32 %v1249_v49, %v1248_v46  ;;  %v1287_v25 = vrot.slane %v1286_v58, 2  ;;  %v1113_v52 = vadd.f32 %v1961_v1, %v2440_v59 }
 0x208   : > { %v2447_v4 = vmax.f32 %v1240_v63, 0.0  ;;  %v1311_v27 = vadd.f32 %v1191_v22, %v2411_v28  ;;  %v1105_v16 = vadd.f32 %v1104_v9, %v2322_v44  ;;  %v965_v14 = vadd.f32 %v964_v60, %v2337_v61 }
 0x209   : > { %v1387_v6 = vrot.slane %v1338_v24, %v2371_v34  ;;  %v2453_v55 = vmax.f32 %v1250_v53, 0.0  ;;  %v2455_v56 = vadd.f32 %v1287_v25, %v1286_v58  ;;  %v1200_v26 = vmul.f32 %v2351_v38, %v1113_v52  ;;  %v974_v45 = vpop.f32.mrb[28].mxu0 }
 0x20a   : > { %v1194_v1 = vmul.f32 %v2326_v48, %v1105_v16  ;;  %v1177_v46 = vmul.f32 %v2314_v35, %v965_v14  ;;  %v967_v28 = vadd.f32 %v966_v8, %v2337_v61  ;;  %v969_v9 = vadd.f32 %v968_v54, %v2369_v32  ;;  %v976_v19 = vpop.f32.mrb[29].mxu0 }
 0x20b   : > { %v1908_v60 = vcombine.low %v1387_v6, %v1387_v6  ;;  %v1904_v40 = vpack.c.bf16 %v2453_v55, %v2447_v4  ;;  %v1289_v36 = vrot.slane %v2455_v56, 1  ;;  %v971_v37 = vadd.f32 %v970_v57, %v2369_v32  ;;  %v978_v38 = vpop.f32.mrb[30].mxu0 }
 0x20c   : > { %v1312_v7 = vadd.f32 %v1311_v27, %v1194_v1  ;;  %v1262_v50 = vadd.f32 %v1261_v5, %v1177_v46  ;;  %v1178_v48 = vmul.f32 %v2317_v39, %v967_v28  ;;  %v1180_v49 = vmul.f32 %v2320_v43, %v969_v9  ;;  %v980_v58 = vpop.f32.mrb[31].mxu0 }
 0x20d   : > { %v1450_v61 = vrot.slane %v1908_v60, %v2371_v34  ;;  %v1380_v8 = vrot.slane %v1904_v40, %v2371_v34  ;;  %v1181_v54 = vmul.f32 %v2324_v47, %v971_v37  ;;  %v975_v63 = vadd.f32 %v974_v45, %v2395_v62 }
 0x20e   : > { %v1313_v22 = vadd.f32 %v1312_v7, %v1197_v12  ;;  %v1272_v24 = vadd.f32 %v1271_v0, %v1178_v48  ;;  %v1263_v53 = vadd.f32 %v1262_v50, %v1180_v49  ;;  %v977_v32 = vadd.f32 %v976_v19, %v2395_v62 }
 0x20f   : > { %v1486_v57 = vunpack.c.l.b16 %v1450_v61  ;;  %v1388_v5 = vcombine.low %v1380_v8, %v1387_v6  ;;  %v1183_v25 = vmul.f32 %v2340_v3, %v975_v63  ;;  %v979_v52 = vadd.f32 %v978_v38, %v2312_v33 }
 0x210   : > { %v1314_v27 = vadd.f32 %v1313_v22, %v1200_v26  ;;  %v1273_v16 = vadd.f32 %v1272_v24, %v1181_v54  ;;  %v1184_v14 = vmul.f32 %v2348_v30, %v977_v32  ;;  %v981_v1 = vadd.f32 %v980_v58, %v2312_v33 }
 0x211   : > { %v1508_v46 = vrot.slane %v1486_v57, 7  ;;  %v1443_v45 = vrot.slane %v1388_v5, %v2371_v34  ;;  %v1264_v12 = vadd.f32 %v1263_v53, %v1183_v25  ;;  %v1186_v0 = vmul.f32 %v2296_v13, %v979_v52  ;;  %v984_v28 = vpop.f32.mrb[32].mxu0 }
 0x212   : > { %v1315_v62 = vrot.slane %v1314_v27, 4  ;;  %v1274_v9 = vadd.f32 %v1273_v16, %v1184_v14  ;;  %v1187_v6 = vmul.f32 %v2298_v15, %v981_v1  ;;  %v985_v19 = vadd.f32 %v984_v28, %v2293_v11  ;;  %v986_v60 = vpop.f32.mrb[33].mxu0 }
 0x213   : > { %v2484_v26 = vsel %vm1494_vm5, %v1508_v46, %v1483_v31  ;;  %v1484_v33 = vunpack.c.l.b16 %v1443_v45  ;;  %v1485_v40 = vunpack.c.h.b16 %v1443_v45  ;;  %v1265_v37 = vrot.slane %v1264_v12, 4  ;;  %v988_v38 = vpop.f32.mrb[34].mxu0 }
 0x214   : > { %v1316_v7 = vadd.f32 %v1315_v62, %v1314_v27  ;;  %v1275_v50 = vrot.slane %v1274_v9, 4  ;;  %v1189_v13 = vmul.f32 %v2300_v18, %v985_v19  ;;  %v987_v48 = vadd.f32 %v986_v60, %v2293_v11  ;;  %v990_v49 = vpop.f32.mrb[35].mxu0 }
 0x215   : > { %v1493_v15 = vrot.slane %v1484_v33, 7  ;;  %v1502_v58 = vrot.slane %v1485_v40, 7  ;;  %v1266_v61 = vadd.f32 %v1265_v37, %v1264_v12  ;;  %v989_v8 = vadd.f32 %v988_v38, %v2322_v44 }
 0x216   : > { %v1276_v10 = vadd.f32 %v1275_v50, %v1274_v9  ;;  %v1291_v54 = vadd.f32 %v1189_v13, %v1186_v0  ;;  %v1190_v31 = vmul.f32 %v2302_v21, %v987_v48  ;;  %v991_v63 = vadd.f32 %v990_v49, %v2322_v44 }
 0x217   : > { %v2494_v22 = vsel %vm1494_vm5, %v1493_v15, %v1481_v2  ;;  %v2499_v11 = vsel %vm1494_vm5, %v1502_v58, %v1482_v29  ;;  %v1267_v18 = vrot.slane %v1266_v61, 2  ;;  %v1192_v24 = vmul.f32 %v2314_v35, %v989_v8 }
 0x218   : > { %v1277_v53 = vrot.slane %v1276_v10, 2  ;;  %v1301_v32 = vadd.f32 %v1190_v31, %v1187_v6  ;;  %v1193_v21 = vmul.f32 %v2317_v39, %v991_v63  ;;  %v1290_v44 = vadd.f32 %v1289_v36, %v2455_v56 }
 0x219   : > { %v1268_v57 = vadd.f32 %v1267_v18, %v1266_v61  ;;  %v1292_v5 = vadd.f32 %v1291_v54, %v1192_v24  ;;  %v994_v25 = vpop.f32.mrb[36].mxu0  ;;  %v1317_v2 = vrot.slane %v1316_v7, 2  ;;  %v1545_v20 = vsel %vm1494_vm5, %v2447_v4, %v2387_v41 }
 0x21a   : > { %v1278_v29 = vadd.f32 %v1277_v53, %v1276_v10  ;;  %v1302_v52 = vadd.f32 %v1301_v32, %v1193_v21  ;;  %v995_v27 = vadd.f32 %v994_v25, %v2421_v23  ;;  %v996_v35 = vpop.f32.mrb[37].mxu0  ;;  %v1329_v16 = vmax.f32 %v1290_v44, 0.0 }
 0x21b   : > { %v1269_v14 = vrot.slane %v1268_v57, 1  ;;  %v997_v39 = vadd.f32 %v996_v35, %v2421_v23  ;;  %v998_v1 = vpop.f32.mrb[38].mxu0  ;;  %v1318_v56 = vadd.f32 %v1317_v2, %v1316_v7  ;;  %v1548_v36 = vsel %vm1494_vm5, %v2453_v55, %v2390_v51 }
 0x21c   : > { %v1279_v46 = vrot.slane %v1278_v29, 1  ;;  %v1195_v45 = vmul.f32 %v2320_v43, %v995_v27  ;;  %v999_v12 = vadd.f32 %v998_v1, %v2440_v59  ;;  %v1000_v0 = vpop.f32.mrb[39].mxu0  ;;  %v1341_v28 = vpack.c.bf16 %v1329_v16, %v1329_v16 }
 0x21d   : > { %v1270_v62 = vadd.f32 %v1269_v14, %v1268_v57  ;;  %v1196_v9 = vmul.f32 %v2324_v47, %v997_v39  ;;  %v1001_v6 = vadd.f32 %v1000_v0, %v2440_v59  ;;  %v1319_v19 = vrot.slane %v1318_v56, 1 }
 0x21e   : > { %v1280_v23 = vadd.f32 %v1279_v46, %v1278_v29  ;;  %v1293_v60 = vadd.f32 %v1292_v5, %v1195_v45  ;;  %v1198_v33 = vmul.f32 %v2340_v3, %v999_v12  ;;  %v1403_v40 = vrot.slane %v1341_v28, %v2371_v34 }
 0x21f   : > { %v1327_v37 = vmax.f32 %v1270_v62, 0.0  ;;  %v1303_v38 = vadd.f32 %v1302_v52, %v1196_v9  ;;  %v1199_v43 = vmul.f32 %v2348_v30, %v1001_v6  ;;  %v1320_v7 = vadd.f32 %v1319_v19, %v1318_v56 }
 0x220   : > { %v1328_v50 = vmax.f32 %v1280_v23, 0.0  ;;  %v1294_v13 = vadd.f32 %v1293_v60, %v1198_v33  ;;  %v1909_v48 = vcombine.low %v1403_v40, %v1403_v40  ;;  %v1551_v47 = vsel %vm1494_vm5, %v2438_v42, %v2399_v17 }
 0x221   : > { %v1304_v59 = vadd.f32 %v1303_v38, %v1199_v43  ;;  %v1332_v49 = vmax.f32 %v1320_v7, 0.0  ;;  %v1546_v15 = vsel %vm1497_vm6, %v1327_v37, %v1545_v20  ;;  %v1552_v3 = vsel %vm1497_vm6, %v1329_v16, %v1551_v47 }
 0x222   : > { %v1905_v58 = vpack.c.bf16 %v1328_v50, %v1327_v37  ;;  %v1295_v61 = vrot.slane %v1294_v13, 4  ;;  %v1465_v8 = vrot.slane %v1909_v48, %v2371_v34  ;;  %v1549_v30 = vsel %vm1497_vm6, %v1328_v50, %v1548_v36 }
 0x223   : > { %v1305_v10 = vrot.slane %v1304_v59, 4  ;;  %v1344_v54 = vpack.c.bf16 %v1332_v49, %v1332_v49  ;;  %v1553_v31 = vsel %vm1500_vm7, %v1332_v49, %v1552_v3  ;;  %v1566_v53 = vmul.f32 %v2387_v41, %v2387_v41 }
 0x224   : > { %v1396_v63 = vrot.slane %v1905_v58, %v2371_v34  ;;  %v1296_v18 = vadd.f32 %v1295_v61, %v1294_v13  ;;  %v1489_v24 = vunpack.c.l.b16 %v1465_v8  ;;  %v1567_v44 = vmul.f32 %v2390_v51, %v2390_v51 }
 0x225   : > { %v1306_v32 = vadd.f32 %v1305_v10, %v1304_v59  ;;  %v1419_v21 = vrot.slane %v1344_v54, %v2371_v34  ;;  %v1568_v57 = vmul.f32 %v2399_v17, %v2399_v17  ;;  %v1569_v20 = vmul.f32 %v2447_v4, %v2447_v4 }
 0x226   : > { %v1297_v5 = vrot.slane %v1296_v18, 2  ;;  %v1404_v25 = vcombine.low %v1396_v63, %v1403_v40  ;;  %v1510_v2 = vrot.slane %v1489_v24, 6  ;;  %v1570_v41 = vmul.f32 %v2453_v55, %v2453_v55 }
 0x227   : > { %v1307_v29 = vrot.slane %v1306_v32, 2  ;;  %v1910_v52 = vcombine.low %v1419_v21, %v1419_v21  ;;  %v1571_v27 = vmul.f32 %v2438_v42, %v2438_v42  ;;  %v1572_v14 = vmul.f32 %v1327_v37, %v1327_v37 }
 0x228   : > { %v1298_v35 = vadd.f32 %v1297_v5, %v1296_v18  ;;  %v1458_v51 = vrot.slane %v1404_v25, %v2371_v34  ;;  %v1511_v17 = vsel %vm1497_vm6, %v1510_v2, %v2484_v26  ;;  %v1573_v56 = vmul.f32 %v1328_v50, %v1328_v50 }
 0x229   : > { %v1308_v39 = vadd.f32 %v1307_v29, %v1306_v32  ;;  %v1480_v1 = vrot.slane %v1910_v52, %v2371_v34  ;;  %v1574_v4 = vmul.f32 %v1329_v16, %v1329_v16  ;;  %v1577_v12 = vmul.f32 %v1332_v49, %v1332_v49 }
 0x22a   : > { %v1299_v36 = vrot.slane %v1298_v35, 1  ;;  %v1487_v46 = vunpack.c.l.b16 %v1458_v51  ;;  %v1488_v45 = vunpack.c.h.b16 %v1458_v51  ;;  %v1590_v42 = vsel %vm1494_vm5, %v1569_v20, %v1566_v53 }
 0x22b   : > { %v1309_v55 = vrot.slane %v1308_v39, 1  ;;  %v1492_v0 = vunpack.c.l.b16 %v1480_v1  ;;  %v1593_v28 = vsel %vm1494_vm5, %v1570_v41, %v1567_v44  ;;  %v1591_v26 = vsel %vm1497_vm6, %v1572_v14, %v1590_v42 }
 0x22c   : > { %v1300_v62 = vadd.f32 %v1299_v36, %v1298_v35  ;;  %v1496_v9 = vrot.slane %v1487_v46, 6  ;;  %v1504_v6 = vrot.slane %v1488_v45, 6  ;;  %v1594_v60 = vsel %vm1497_vm6, %v1573_v56, %v1593_v28 }
 0x22d   : > { %v1310_v19 = vadd.f32 %v1309_v55, %v1308_v39  ;;  %v1512_v23 = vrot.slane %v1492_v0, 5  ;;  %v1596_v16 = vsel %vm1494_vm5, %v1571_v27, %v1568_v57 }
 0x22e   : > { %v1330_v33 = vmax.f32 %v1300_v62, 0.0  ;;  %v1498_v40 = vsel %vm1497_vm6, %v1496_v9, %v2494_v22  ;;  %v1505_v37 = vsel %vm1497_vm6, %v1504_v6, %v2499_v11  ;;  %v1597_v38 = vsel %vm1497_vm6, %v1574_v4, %v1596_v16 }
 0x22f   : > { %v1331_v43 = vmax.f32 %v1310_v19, 0.0  ;;  %v1513_v7 = vsel %vm1500_vm7, %v1512_v23, %v1511_v17  ;;  %v1598_v50 = vsel %vm1500_vm7, %v1577_v12, %v1597_v38 }
 0x230   : > { %v1547_v13 = vsel %vm1500_vm7, %v1330_v33, %v1546_v15  ;;  %v1575_v48 = vmul.f32 %v1330_v33, %v1330_v33  ;;  %v1560_v15 = vsel %vm860_vm4, %v1553_v31, 0.0  ;;  %v1605_v24 = vsel %vm860_vm4, %v1598_v50, 0.0 }
 0x231   : > { %v1906_v47 = vpack.c.bf16 %v1331_v43, %v1330_v33  ;;  %v1550_v59 = vsel %vm1500_vm7, %v1331_v43, %v1549_v30  ;;  %v1557_v49 = vsel %vm860_vm4, %v1547_v13, 0.0  ;;  %v1576_v3 = vmul.f32 %v1331_v43, %v1331_v43 }
 0x232   : > { %v1558_v22 = vsel %vm860_vm4, %v1550_v59, 0.0  ;;  %v1592_v11 = vsel %vm1500_vm7, %v1575_v48, %v1591_v26  ;;  %v1515_v2 = vpack.c.b16 %v1513_v7, %v1513_v7 }
 0x233   : > { %v1412_v58 = vrot.slane %v1906_v47, %v2371_v34  ;;  %v1559_v61 = vadd.f32 %v1558_v22, %v1557_v49  ;;  %v1595_v8 = vsel %vm1500_vm7, %v1576_v3, %v1594_v60  ;;  %v1602_v10 = vsel %vm860_vm4, %v1592_v11, 0.0 }
 0x234   : > { %v1603_v54 = vsel %vm860_vm4, %v1595_v8, 0.0  ;;  %v1529_v29 = vrot.slane %v1515_v2, %v2371_v34 }
 0x235   : > { %v1420_v30 = vcombine.low %v1412_v58, %v1419_v21  ;;  %v1561_v63 = vadd.f32 %v1560_v15, %v1559_v61  ;;  %v1604_v18 = vadd.f32 %v1603_v54, %v1602_v10 }
 0x237   : > { %v1473_v53 = vrot.slane %v1420_v30, %v2371_v34  ;;  %1562 = vadd.xlane.f32.xlu1 %v1561_v63  ;;  %v1606_v32 = vadd.f32 %v1605_v24, %v1604_v18 }
 0x239   : > { %v1490_v44 = vunpack.c.l.b16 %v1473_v53  ;;  %v1491_v57 = vunpack.c.h.b16 %v1473_v53  ;;  %1607 = vadd.xlane.f32.xlu0 %v1606_v32 }
 0x23b   : > { %v1499_v5 = vrot.slane %v1490_v44, 5  ;;  %v1506_v25 = vrot.slane %v1491_v57, 5 }
 0x23d   : > { %v1501_v31 = vsel %vm1500_vm7, %v1499_v5, %v1498_v40  ;;  %v1507_v21 = vsel %vm1500_vm7, %v1506_v25, %v1505_v37 }
 0x23e   : > { %v1514_v20 = vpack.c.b16 %v1507_v21, %v1501_v31 }
 0x240   : > { %v1522_v52 = vrot.slane %v1514_v20, %v2371_v34 }
 0x242   : > { %v1530_v41 = vcombine.low %v1522_v52, %v1529_v29 }
 0x244   : > { %1532 = vst [vmem:[%s452_s26] sm:$0x3f] %v1530_v41 }
 0x2c4   : > { %v1563_v27 = vpop.xlane.xlu1 %1562 }
 0x2c5   : > { %1565 = vst.msk [vmem:[%s460_s13] sm:$0xf] %vm1564_vm8, %v1563_v27 }
 0x2c6   : > { %v1608_v35 = vpop.xlane.xlu0 %1607 }
 0x2c7   : > { %1609 = vst.msk [vmem:[%s467_s16] sm:$0xf] %vm1564_vm8, %v1608_v35 }
 0x2c8 PF: > { %s20_s11 = sadd.s32 1, %s2039_s11   ;;  %s2603_s30 = smov %s2035_s10 }
 0x2c9   : > { %p17_p5 = scmp.ge.s32.totalorder %s20_s11, 4   ;;  %s2604_s10 = smov %s2606_s12 }
 0x2cb   :  { %19 = sbr.rel (!%p17_p5) target bundleno = 2 (0x2), region = 113 }

</bundles_post_ra>
